<compile_context>
chip_gen: v5e
topology: v5e:2x2
jax: 0.10.0
libtpu: 0.0.40
codegen_flags: <defaults>
</compile_context>

<pallas_src>
import numpy as np
import jax
import jax.numpy as jnp
from jax.experimental import pallas as pl
from jax.experimental.pallas import tpu as pltpu


def _omega_kernel(x_ref, omg_ref, o_ref):
    """Rotate-by-omega on consecutive channel pairs.

    x_ref:   (R, T) tile; rows alternate (even channel, odd channel) of each pair.
    omg_ref: (R, 1) signed per-row omega (+||w|| on even rows, -||w|| on odd rows).
    o_ref:   (R, T): out[2k] = +w*x[2k+1], out[2k+1] = -w*x[2k].
    """
    x = x_ref[...]
    r = x.shape[0]  # static tile row count (always even)
    # Pairwise sublane swap: even rows take the row below, odd rows the row above.
    up = pltpu.roll(x, r - 1, 0)   # out[i] = x[(i + 1) % r]
    dn = pltpu.roll(x, 1, 0)       # out[i] = x[(i - 1) % r]
    row_ids = jax.lax.broadcasted_iota(jnp.int32, (r, 1), 0)
    partner = jnp.where((row_ids % 2) == 0, up, dn)
    o_ref[...] = (omg_ref[...] * partner).astype(o_ref.dtype)


def omega_layer_forward(x, omg_param, *, global_omg=False):
    """AKOrN OmegaLayer forward. x: (B, C, H, W); omg_param: (C//2, 2) or (2,)."""
    B, C, H, W = x.shape
    assert C % 2 == 0, "channel count must be even (n=2 rotation pairs)"
    hw = H * W
    rows = B * C
    itemsize = np.dtype(x.dtype).itemsize

    # ---- per-row signed omega (tiny; computed once in the wrapper, not per step) ----
    p = omg_param.astype(jnp.float32)
    if global_omg:
        omg_vec = jnp.full((C // 2,), jnp.linalg.norm(p), dtype=jnp.float32)
    else:
        omg_vec = jnp.linalg.norm(p, axis=1)                       # (C//2,)
    per_ch = jnp.stack([omg_vec, -omg_vec], axis=1).reshape(C)     # +w0,-w0,+w1,-w1,...
    signed_omg = jnp.tile(per_ch, B).reshape(rows, 1).astype(x.dtype)

    # ---- free contiguous view: one row per (batch, channel) ----
    x2 = x.reshape(rows, hw)

    # ---- generation-aware block budget & VMEM limit ----
    try:
        vmem_cap = int(pltpu.get_tpu_info().vmem_capacity_bytes)
    except Exception:
        vmem_cap = 64 * 1024 * 1024          # conservative default (v7x per-TC VMEM)
    if vmem_cap >= 128 * 1024 * 1024:        # v5e / v6e: 128 MiB VMEM, single TC
        block_budget = 8 * 1024 * 1024
        vmem_limit = 64 * 1024 * 1024
    else:                                    # v7x: 64 MiB per TC, 2 TCs share the chip
        block_budget = 4 * 1024 * 1024
        vmem_limit = 32 * 1024 * 1024

    # ---- lane tiling: full hw by default (full-extent last dim is exempt from the
    #      /128 rule -> no host-side padding); split only when even an 8-row slab
    #      would blow the block budget and hw has a 128-multiple divisor. ----
    lane_tile = hw
    if 8 * hw * itemsize > block_budget:
        for cand in (65536, 32768, 16384, 8192, 4096, 2048, 1024, 512, 256, 128):
            if hw % cand == 0 and 8 * cand * itemsize <= block_budget:
                lane_tile = cand
                break
        # TODO(synk): a huge hw that is not a multiple of 128 keeps the full row
        # (may exceed the budget); a masked lane-tail store would allow splitting it.
    lane_blocks = hw // lane_tile
    lane_tile_padded = ((lane_tile + 127) // 128) * 128

    # ---- row tiling: dtype-aware sublane granularity; pairs never straddle a block;
    #      cdiv grid (ragged edge blocks are masked) instead of a full-dim fallback. ----
    sub = max(8, 32 // itemsize)             # f32: 8, bf16: 16, int8/fp8: 32 (even)
    if rows <= sub:
        row_tile = rows                      # full extent (always legal; rows is even)
    else:
        row_tile = (block_budget // (lane_tile_padded * itemsize)) // sub * sub
        row_tile = int(max(sub, min(row_tile, 1024)))
        # keep >= 2 row blocks so both v7x TensorCores get work
        half = ((rows + 1) // 2 + sub - 1) // sub * sub
        row_tile = min(row_tile, max(sub, half))
    row_blocks = pl.cdiv(rows, row_tile)

    out2 = pl.pallas_call(
        _omega_kernel,
        out_shape=jax.ShapeDtypeStruct((rows, hw), x.dtype),
        grid_spec=pltpu.PrefetchScalarGridSpec(
            num_scalar_prefetch=0,
            grid=(row_blocks, lane_blocks),
            in_specs=[pl.BlockSpec((row_tile, lane_tile), lambda r, s: (r, s)),
                      pl.BlockSpec((row_tile, 1), lambda r, s: (r, 0))],
            out_specs=pl.BlockSpec((row_tile, lane_tile), lambda r, s: (r, s)),
        ),
        compiler_params=pltpu.CompilerParams(
            dimension_semantics=("parallel", "parallel"),
            vmem_limit_bytes=vmem_limit,
        ),
    )(x2, signed_omg)

    return out2.reshape(B, C, H, W)


def _reference_forward(x, omg_param, *, global_omg=False):
    B, C, H, W = x.shape
    ch2 = C // 2
    _x = x.reshape(B, ch2, 2, H, W)
    if global_omg:
        omg = jnp.full((ch2,), jnp.linalg.norm(omg_param))
    else:
        omg = jnp.linalg.norm(omg_param, axis=1)
    omg = omg[None, :, None, None]
    out = jnp.stack([omg * _x[:, :, 1], -omg * _x[:, :, 0]], axis=2)
    return out.reshape(B, C, H, W)


if __name__ == "__main__":
    key = jax.random.PRNGKey(0)
    # Module config: n=4 (even), ch=4, init_omg=0.1, learn_omg=True
    ch = 4
    init_omg = 0.1
    x = jax.random.normal(key, (2, ch, 16, 16), dtype=jnp.float32)

    # per-pair parameter: init_omg * 1/sqrt(2) * ones(ch//2, 2)
    omg_param = (init_omg / np.sqrt(2.0)) * jnp.ones((ch // 2, 2), jnp.float32)
    out = jax.block_until_ready(omega_layer_forward(x, omg_param, global_omg=False))
    ref = _reference_forward(x, omg_param, global_omg=False)
    assert out.shape == x.shape and out.dtype == x.dtype
    assert jnp.allclose(out, ref, atol=1e-6, rtol=1e-6), "per-pair omega mismatch"

    # global-omega variant: omg_param is a single 2-vector
    omg_param_g = (init_omg / np.sqrt(2.0)) * jnp.ones((2,), jnp.float32)
    out_g = jax.block_until_ready(
        omega_layer_forward(x, omg_param_g, global_omg=True))
    ref_g = _reference_forward(x, omg_param_g, global_omg=True)
    assert jnp.allclose(out_g, ref_g, atol=1e-6, rtol=1e-6), "global omega mismatch"

    # non-128-multiple spatial size (exercises the new no-pad, full-extent-lane path)
    x7 = jax.random.normal(jax.random.PRNGKey(1), (2, 8, 7, 7), dtype=jnp.float32)
    omg_param7 = jax.random.normal(jax.random.PRNGKey(2), (4, 2), jnp.float32)
    out7 = jax.block_until_ready(omega_layer_forward(x7, omg_param7, global_omg=False))
    ref7 = _reference_forward(x7, omg_param7, global_omg=False)
    assert jnp.allclose(out7, ref7, atol=1e-6, rtol=1e-6), "7x7 omega mismatch"

    print("KERNEL_OK")
</pallas_src>

<mosaic_0001>
module attributes {stable_mosaic.version = 11 : i64} {
  func.func @_omega_kernel(%arg0: i32, %arg1: i32, %arg2: memref<8x256xf32, #tpu.memory_space<vmem>>, %arg3: memref<8x1xf32, #tpu.memory_space<vmem>>, %arg4: memref<8x256xf32, #tpu.memory_space<vmem>>) attributes {dimension_semantics = [#tpu.dimension_semantics<parallel>, #tpu.dimension_semantics<parallel>], iteration_bounds = array<i64: 1, 1>, scalar_prefetch = 0 : i64, scratch_operands = 0 : i64, tpu.core_type = #tpu.core_type<tc>, window_params = [{transform_indices = @transform_0, window_bounds = array<i64: 8, 256>}, {transform_indices = @transform_1, window_bounds = array<i64: 8, 1>}, {transform_indices = @transform_2, window_bounds = array<i64: 8, 256>}]} {
    %c0 = arith.constant 0 : index
    %c0_0 = arith.constant 0 : index
    %0 = vector.load %arg2[%c0, %c0_0] : memref<8x256xf32, #tpu.memory_space<vmem>>, vector<8x256xf32>
    %c7_i32 = arith.constant 7 : i32
    %1 = tpu.dynamic_rotate %0 by %c7_i32 dim 0 : vector<8x256xf32>, i32 -> vector<8x256xf32>
    %c1_i32 = arith.constant 1 : i32
    %2 = tpu.dynamic_rotate %0 by %c1_i32 dim 0 : vector<8x256xf32>, i32 -> vector<8x256xf32>
    %3 = tpu.iota {dimensions = array<i32: 0>} : vector<8x1xi32>
    %c2_i32 = arith.constant 2 : i32
    %c0_i32 = arith.constant 0 : i32
    %4 = arith.cmpi eq, %c2_i32, %c0_i32 : i32
    %c1_i32_1 = arith.constant 1 : i32
    %5 = arith.select %4, %c1_i32_1, %c2_i32 : i32
    %6 = vector.broadcast %5 : i32 to vector<8x1xi32>
    %7 = arith.remsi %3, %6 : vector<8x1xi32>
    %c0_i32_2 = arith.constant 0 : i32
    %8 = vector.broadcast %c0_i32_2 : i32 to vector<8x1xi32>
    %9 = arith.cmpi ne, %7, %8 : vector<8x1xi32>
    %c0_i32_3 = arith.constant 0 : i32
    %10 = vector.broadcast %c0_i32_3 : i32 to vector<8x1xi32>
    %11 = arith.cmpi slt, %7, %10 : vector<8x1xi32>
    %c0_i32_4 = arith.constant 0 : i32
    %12 = arith.cmpi slt, %5, %c0_i32_4 : i32
    %13 = vector.broadcast %12 : i1 to vector<8x1xi1>
    %14 = vector.broadcast %13 : vector<8x1xi1> to vector<8x1xi1>
    %15 = arith.xori %11, %14 : vector<8x1xi1>
    %16 = arith.andi %15, %9 : vector<8x1xi1>
    %17 = vector.broadcast %5 : i32 to vector<8x1xi32>
    %18 = arith.addi %7, %17 : vector<8x1xi32>
    %19 = arith.select %16, %18, %7 : vector<8x1xi1>, vector<8x1xi32>
    %c0_i32_5 = arith.constant 0 : i32
    %20 = vector.broadcast %c0_i32_5 : i32 to vector<8x1xi32>
    %21 = arith.cmpi eq, %19, %20 : vector<8x1xi32>
    %22 = vector.shape_cast %21 : vector<8x1xi1> to vector<8x1xi1>
    %23 = vector.broadcast %22 : vector<8x1xi1> to vector<8x256xi1>
    %24 = arith.select %23, %1, %2 : vector<8x256xi1>, vector<8x256xf32>
    %c0_6 = arith.constant 0 : index
    %c0_7 = arith.constant 0 : index
    %25 = vector.load %arg3[%c0_6, %c0_7] : memref<8x1xf32, #tpu.memory_space<vmem>>, vector<8x1xf32>
    %26 = vector.broadcast %25 : vector<8x1xf32> to vector<8x256xf32>
    %27 = arith.mulf %26, %24 : vector<8x256xf32>
    %c0_8 = arith.constant 0 : index
    %c0_9 = arith.constant 0 : index
    %28 = vector.load %arg4[%c0_8, %c0_9] : memref<8x256xf32, #tpu.memory_space<vmem>>, vector<8x256xf32>
    tpu.vector_store %arg4[%c0_8, %c0_9], %27 {strides = array<i32>} : memref<8x256xf32, #tpu.memory_space<vmem>>, vector<8x256xf32>,
    return
  }
  func.func @transform_0(%arg0: i32, %arg1: i32) -> (i32, i32) {
    %c0_i32 = arith.constant 0 : i32
    return %arg0, %arg1 : i32, i32
  }
  func.func @transform_1(%arg0: i32, %arg1: i32) -> (i32, i32) {
    %c0_i32 = arith.constant 0 : i32
    %c0_i32_0 = arith.constant 0 : i32
    return %arg0, %c0_i32 : i32, i32
  }
  func.func @transform_2(%arg0: i32, %arg1: i32) -> (i32, i32) {
    %c0_i32 = arith.constant 0 : i32
    return %arg0, %arg1 : i32, i32
  }
}

</mosaic_0001>

<bundles_post_ra>
// kernel: tpu_custom_call.1
= control target key start
LH: loop header
LB: loop body
LE: loop exit
PB: predicated region body
PF: predicated region fallthrough
CT: control target
= control target key end

     0   :  { %7 = vsyncpa [#allocation3], 0  ;;  %s161_s0 = inlined_call_operand.hbm [shape: f32[8,256], index: 0, kind: input, shape index: {}]   ;;  %s162_s1 = inlined_call_operand.vmem [shape: f32[8,1], index: 1, kind: input, shape index: {}]   ;;  %s163_s2 = inlined_call_operand.hbm [shape: f32[8,256], index: 2, kind: output, shape index: {}]  }
   0x1   :  { %8 = vsyncpa [#allocation4], 0  ;;  %s14_s11 = sshll.u32 %s161_s0, 4  ;;  %s134_s12 = smov [#allocation2]   ;;  %s15_s11 = int_to_ptr.hbm [resolvable:$true] %s14_s11 }
   0x2   :  { %s16_s13 = sshll.u32 %s134_s12, 4  ;;  %s17_s13 = int_to_ptr.vmem [resolvable:$true] %s16_s13 }
   0x3   :  { %19 = dma.hbm_to_vmem [thread:$0]  %s15_s11, 256, %s17_s13, [#allocation3]  }
   0x4   :  { %130 = dma.done.wait [#allocation3], 256  }
   0x5   :  { %131 = vsyncadd [#allocation3], 4294967040  ;;  %v135_v0 = vmov 0   ;;  %v51_v1 = vld [vmem:[%s162_s1] sm:$0xff]  ;;  %v32_v2 = vlaneseq  ;;  %v27_v6 = vld [vmem:[#allocation2 + $0x8] sm:$0xff]  ;;  %s136_s0 = smov [#allocation5]  }
   0x6   :  { %81 = vset.pattern.permute.xlu0 %v135_v0  ;;  %v26_v5 = vld [vmem:[#allocation2] sm:$0xff]  ;;  %v29_v8 = vrot.slane %v27_v6, 1  ;;  %v31_v10 = vrot.slane %v27_v6, 7  ;;  %s66_s16 = sshll.u32 %s136_s0, 4  ;;  %s68_s19 = sshll.u32 %s163_s2, 4  ;;  %s67_s16 = int_to_ptr.vmem [resolvable:$true] %s66_s16  ;;  %s69_s19 = int_to_ptr.hbm [resolvable:$true] %s68_s19 }
   0x7   :  { %54 = vperm.xlu0 %81, %v51_v1   ;;  %v33_v3 = vshrl.u32 %v32_v2, 7  ;;  %v28_v7 = vrot.slane %v26_v5, 1  ;;  %v30_v9 = vrot.slane %v26_v5, 7 }
   0x9   :  { %v38_v4 = vand.u32 1, %v33_v3 }
   0xb   :  { %vm46_vm0 = vcmp.eq.s32.totalorder %v38_v4, 0 }
   0xc   :  { %v49_v11 = vsel %vm46_vm0, %v28_v7, %v30_v9  ;;  %v50_v12 = vsel %vm46_vm0, %v29_v8, %v31_v10 }
  0x79   :  { %v55_v13 = vpop.permute.xlu0 %54 }
  0x7a   :  { %v57_v14 = vmul.f32 %v55_v13, %v49_v11  ;;  %v58_v15 = vmul.f32 %v55_v13, %v50_v12 }
  0x7c   :  { %59 = vst [vmem:[#allocation5] sm:$0xff] %v57_v14 }
  0x7d   :  { %60 = vst [vmem:[#allocation5 + $0x8] sm:$0xff] %v58_v15 }
  0x7e   :  { %71 = dma.vmem_to_hbm [thread:$0]  %s67_s16, 256, %s69_s19, [#allocation4]  }
  0x7f   :  { %132 = dma.done.wait [#allocation4], 256  }
  0x80   :  { %133 = vsyncadd [#allocation4], 4294967040 }
  0x81   :  { %76 = vsyncpa [#allocation3], 1 }
  0x82   :  { %77 = vsyncpa [#allocation4], 1 }

</bundles_post_ra>
